<compile_context>
chip_gen: v7x
topology: tpu7x:2x2x1
jax: 0.10.0
libtpu: 0.0.40
codegen_flags: <defaults>
</compile_context>

<pallas_src>
import jax
import jax.numpy as jnp
from jax import lax
from jax.experimental import pallas as pl
from jax.experimental.pallas import tpu as pltpu


_VMEM_LIMIT = 32 << 20      # scoped-VMEM request; safe on v5e/v6e/v7x
_BLOCK_ELEMS = 256 * 2048   # ~2 MiB f32 per streaming buffer (1-4 MiB sweet spot)
_FAST_BUDGET = 24 << 20     # budget gate for the single-pass fast path


def _tile_bytes_f32(r, c):
    """f32 VMEM footprint of an (r, c) block after (8, 128) tiling."""
    return ((r + 7) // 8) * ((c + 127) // 128) * (8 * 128 * 4)


# ---------------------------------------------------------------------------
# Fast path: whole array resident in VMEM, one launch, 2N bytes of HBM traffic.
# ---------------------------------------------------------------------------
def _make_fast_kernel(inv_n):
    def kernel(x_ref, o_ref):
        xf = x_ref[...].astype(jnp.float32)
        mean = jnp.sum(xf) * inv_n
        o_ref[...] = (xf - mean).astype(o_ref.dtype)
    return kernel


def _fast_layout(n):
    """Pick an (r, c) reshape of the flat array that packs sublanes well."""
    for r in (1024, 512, 256, 128, 64, 32, 16, 8):
        if n % r == 0 and n // r >= 128:
            return r, n // r
    return 1, n


def _centered_fast(x2d, n, out_dtype):
    r, c = x2d.shape
    return pl.pallas_call(
        _make_fast_kernel(1.0 / n),
        out_shape=jax.ShapeDtypeStruct((r, c), out_dtype),
        grid=(1,),
        in_specs=[pl.BlockSpec((r, c), lambda i: (0, 0))],
        out_specs=pl.BlockSpec((r, c), lambda i: (0, 0)),
        compiler_params=pltpu.CompilerParams(vmem_limit_bytes=_VMEM_LIMIT),
    )(x2d)


# ---------------------------------------------------------------------------
# Streaming pass 1: independent per-block partial sums on a "parallel" grid.
# ---------------------------------------------------------------------------
def _make_partial_sum_kernel(block_rows, lanes, rows):
    n_blocks = pl.cdiv(rows, block_rows)
    tail_rows = rows - (n_blocks - 1) * block_rows   # valid rows in last block
    ragged = tail_rows != block_rows

    def block_sum(xf):
        if block_rows % 8 == 0:
            # Layout-friendly: fold sublane-tile groups with pure vreg adds
            # first; only a tiny (8, lanes) cross-lane reduction remains.
            xf = xf.reshape(block_rows // 8, 8, lanes).sum(axis=0)
        return jnp.sum(xf)

    def scalar_tile(s):
        # Put the block's partial sum at [0, 0] of an (8, 128)-aligned tile.
        r = lax.broadcasted_iota(jnp.int32, (8, 128), 0)
        c = lax.broadcasted_iota(jnp.int32, (8, 128), 1)
        return jnp.where((r == 0) & (c == 0), s, 0.0)

    def kernel(x_ref, psum_ref):
        xf = x_ref[...].astype(jnp.float32)
        if not ragged:
            psum_ref[...] = scalar_tile(block_sum(xf))
        else:
            i = pl.program_id(0)

            @pl.when(i < n_blocks - 1)
            def _():
                psum_ref[...] = scalar_tile(block_sum(xf))

            @pl.when(i == n_blocks - 1)
            def _():
                # Boundary block: rows >= tail_rows are out-of-bounds padding.
                rid = lax.broadcasted_iota(jnp.int32, xf.shape, 0)
                xm = jnp.where(rid < tail_rows, xf, 0.0)
                psum_ref[...] = scalar_tile(block_sum(xm))

    return kernel


# ---------------------------------------------------------------------------
# Streaming pass 2: elementwise subtract of the scalar mean (read from SMEM).
# ---------------------------------------------------------------------------
def _center_kernel(mean_ref, x_ref, o_ref):
    mean = mean_ref[0, 0]
    o_ref[...] = (x_ref[...].astype(jnp.float32) - mean).astype(o_ref.dtype)


def _centered_two_pass(x2d, n, out_dtype):
    rows, lanes = x2d.shape
    block_rows = min(_BLOCK_ELEMS // lanes, rows)
    n_blocks = pl.cdiv(rows, block_rows)
    tile_spec = pl.BlockSpec((block_rows, lanes), lambda i: (i, 0))

    # Pass 1: per-block partial sums, fully parallel (uses both TCs on v7x).
    partials = pl.pallas_call(
        _make_partial_sum_kernel(block_rows, lanes, rows),
        out_shape=jax.ShapeDtypeStruct((n_blocks * 8, 128), jnp.float32),
        grid=(n_blocks,),
        in_specs=[tile_spec],
        out_specs=pl.BlockSpec((8, 128), lambda i: (i, 0)),
        compiler_params=pltpu.CompilerParams(
            dimension_semantics=("parallel",),
            vmem_limit_bytes=_VMEM_LIMIT),
    )(x2d)
    mean = (jnp.sum(partials) * (1.0 / n)).reshape(1, 1)

    # Pass 2: streaming subtract, lane-dense output blocks.
    return pl.pallas_call(
        _center_kernel,
        out_shape=jax.ShapeDtypeStruct((rows, lanes), out_dtype),
        grid=(n_blocks,),
        in_specs=[pl.BlockSpec(memory_space=pltpu.MemorySpace.SMEM), tile_spec],
        out_specs=tile_spec,
        compiler_params=pltpu.CompilerParams(
            dimension_semantics=("parallel",),
            vmem_limit_bytes=_VMEM_LIMIT),
    )(mean, x2d)


def centered_layer(x, *, force_two_pass=False):
    """Pallas equivalent of CenteredLayer.forward: X - X.mean(), any shape."""
    orig_shape = x.shape
    orig_dtype = x.dtype
    n = x.size
    assert n > 0
    flat = x.reshape(-1)

    if not force_two_pass:
        r, c = _fast_layout(n)
        if 4 * _tile_bytes_f32(r, c) <= _FAST_BUDGET:
            return _centered_fast(flat.reshape(r, c), n, orig_dtype).reshape(orig_shape)

    # Streaming path.  Whenever numel is a multiple of 128 (virtually all NN
    # shapes) the 2-D view is a free reshape: no pad copy, no post-slice copy.
    lanes = next((l for l in (2048, 1024, 512, 256, 128) if n % l == 0), None)
    padded = lanes is None
    if padded:
        # TODO(synk): rare fallback (numel not a multiple of 128) still pays one
        # pad copy + one slice copy; a masked ragged-lane tail could remove it.
        lanes = 2048
        flat = jnp.pad(flat, (0, (-n) % lanes))
    x2d = flat.reshape(flat.size // lanes, lanes)

    out2d = _centered_two_pass(x2d, n, orig_dtype)
    out_flat = out2d.reshape(-1)
    if padded:
        out_flat = out_flat[:n]
    return out_flat.reshape(orig_shape)


if __name__ == "__main__":
    key = jax.random.PRNGKey(0)
    k1, k2, k3, k4 = jax.random.split(key, 4)

    # 1) Spec-sized input (batch=2, channels=4, 16x16 spatial): fast path.
    x = jax.random.normal(k1, (2, 4, 16, 16), dtype=jnp.float32)
    out = centered_layer(x)
    jax.block_until_ready(out)
    ref = x - jnp.mean(x)
    assert out.shape == x.shape and out.dtype == x.dtype
    assert jnp.allclose(out, ref, atol=1e-5, rtol=1e-5)
    assert jnp.abs(jnp.mean(out)) < 1e-5

    # 2) Non-aligned shape (no padding anywhere on the fast path).
    x2 = jax.random.normal(k2, (3, 5, 7), dtype=jnp.float32)
    out2 = centered_layer(x2)
    jax.block_until_ready(out2)
    assert jnp.allclose(out2, x2 - jnp.mean(x2), atol=1e-5, rtol=1e-5)

    # 3) Streaming two-pass path: lane-exact reshape + ragged row tail.
    x3 = jax.random.normal(k3, (600, 2048), dtype=jnp.float32)
    out3 = centered_layer(x3, force_two_pass=True)
    jax.block_until_ready(out3)
    assert jnp.allclose(out3, x3 - jnp.mean(x3), atol=1e-5, rtol=1e-5)

    # 4) Streaming-path fallback for element counts not divisible by 128.
    x4 = jax.random.normal(k4, (123, 321), dtype=jnp.float32)
    out4 = centered_layer(x4, force_two_pass=True)
    jax.block_until_ready(out4)
    assert jnp.allclose(out4, x4 - jnp.mean(x4), atol=1e-5, rtol=1e-5)

    print("KERNEL_OK")
</pallas_src>

<mosaic_0001>
module attributes {stable_mosaic.version = 11 : i64} {
  func.func @kernel(%arg0: i32, %arg1: memref<16x128xf32, #tpu.memory_space<vmem>>, %arg2: memref<16x128xf32, #tpu.memory_space<vmem>>) attributes {dimension_semantics = [#tpu.dimension_semantics<arbitrary>], iteration_bounds = array<i64: 1>, scalar_prefetch = 0 : i64, scratch_operands = 0 : i64, tpu.core_type = #tpu.core_type<tc>, window_params = [{pipeline_mode = #tpu.pipeline_mode<synchronous>, transform_indices = @transform_0, window_bounds = array<i64: 16, 128>}, {pipeline_mode = #tpu.pipeline_mode<synchronous>, transform_indices = @transform_1, window_bounds = array<i64: 16, 128>}]} {
    %c0 = arith.constant 0 : index
    %c0_0 = arith.constant 0 : index
    %0 = vector.load %arg1[%c0, %c0_0] : memref<16x128xf32, #tpu.memory_space<vmem>>, vector<16x128xf32>
    %1 = vector.shape_cast %0 : vector<16x128xf32> to vector<1x16x128xf32>
    %cst = arith.constant dense<0.000000e+00> : vector<1xf32>
    %2 = vector.multi_reduction <add>, %1, %cst [1, 2] : vector<1x16x128xf32> to vector<1xf32>
    %3 = vector.shape_cast %2 : vector<1xf32> to vector<1x1x1xf32>
    %4 = vector.extract %3[0, 0, 0] : f32 from vector<1x1x1xf32>
    %cst_1 = arith.constant 4.8828125E-4 : f32
    %5 = arith.mulf %4, %cst_1 : f32
    %6 = vector.broadcast %5 : f32 to vector<16x128xf32>
    %7 = arith.subf %0, %6 : vector<16x128xf32>
    %c0_2 = arith.constant 0 : index
    %c0_3 = arith.constant 0 : index
    %8 = vector.load %arg2[%c0_2, %c0_3] : memref<16x128xf32, #tpu.memory_space<vmem>>, vector<16x128xf32>
    tpu.vector_store %arg2[%c0_2, %c0_3], %7 {strides = array<i32>} : memref<16x128xf32, #tpu.memory_space<vmem>>, vector<16x128xf32>,
    return
  }
  func.func @transform_0(%arg0: i32) -> (i32, i32) {
    %c0_i32 = arith.constant 0 : i32
    %c0_i32_0 = arith.constant 0 : i32
    %c0_i32_1 = arith.constant 0 : i32
    return %c0_i32, %c0_i32_0 : i32, i32
  }
  func.func @transform_1(%arg0: i32) -> (i32, i32) {
    %c0_i32 = arith.constant 0 : i32
    %c0_i32_0 = arith.constant 0 : i32
    %c0_i32_1 = arith.constant 0 : i32
    return %c0_i32, %c0_i32_0 : i32, i32
  }
}

</mosaic_0001>

<bundles_post_ra>
// kernel: tpu_custom_call.1
= control target key start
LH: loop header
LB: loop body
LE: loop exit
PB: predicated region body
PF: predicated region fallthrough
CT: control target
= control target key end

     0   :  { %6 = vsyncpa [#allocation3], 0  ;;  %s156_s0 = inlined_call_operand.hbm [shape: f32[16,128], index: 0, kind: input, shape index: {}]   ;;  %s157_s1 = inlined_call_operand.hbm [shape: f32[16,128], index: 1, kind: output, shape index: {}]  }
   0x1   :  { %7 = vsyncpa [#allocation4], 0  ;;  %s112_s6 = smov [#allocation2]   ;;  %s64_s10 = scalar_lea.hbm %s156_s0, 256 }
   0x2   :  { %s13_s7 = sshll.u32 %s112_s6, 4  ;;  %p65_p0 = scmp.ne.s32.totalorder %s156_s0, %s64_s10  ;;  %s14_s7 = int_to_ptr.vmem [resolvable:$true] %s13_s7 }
   0x3   :  { %p68_p1 = scmp.lt.u32.totalorder %s64_s10, %s156_s0 }
   0x5   :  { %p70_p2 = pnand %p68_p1, %p65_p0 }
   0x7   :  { %73 = shalt.err (!%p70_p2)
}
   0x8   :  { %s74_s15 = scalar_lea.vmem %s14_s7, 256  ;;  %p79_p4 = scmp.lt.s32.totalorder %s14_s7, %s14_s7 }
   0x9   :  { %p75_p3 = scmp.ne.s32.totalorder %s14_s7, %s74_s15  ;;  %p80_p5 = scmp.lt.s32.totalorder %s74_s15, %s74_s15 }
   0xb   :  { %p81_p6 = por %p80_p5, %p79_p4 }
   0xd   :  { %p82_p7 = pnand %p81_p6, %p75_p3 }
   0xf   :  { %85 = shalt.err (!%p82_p7)
}
  0x10   :  { %s113_s16 = smov 128   ;;  %s114_s17 = smov 8  }
  0x11   :  { %19 = dma.hbm_to_vmem [thread:$0]  %s156_s0, 256, %s14_s7, [#allocation3], %s113_s16, %s113_s16, %s114_s17  }
  0x12   :  { %108 = dma.done.wait [#allocation3], 256  }
  0x13   :  { %109 = vsyncadd [#allocation3], 4294967040  ;;  %v23_v0 = vld [vmem:[#allocation2] sm:$0xff]  ;;  %v24_v1 = vld [vmem:[#allocation2 + $0x8] sm:$0xff]  ;;  %s115_s22 = smov [#allocation5]  }
  0x14   :  { %v25_v2 = vadd.f32 %v24_v1, %v23_v0  ;;  %s46_s23 = sshll.u32 %s115_s22, 4  ;;  %s47_s23 = int_to_ptr.vmem [resolvable:$true] %s46_s23 }
  0x15   :  { %s86_s0 = scalar_lea.vmem %s47_s23, 256  ;;  %p91_p9 = scmp.lt.s32.totalorder %s47_s23, %s47_s23 }
  0x16   :  { %26 = vadd.xlane.f32.xlu0 %v25_v2  ;;  %p87_p8 = scmp.ne.s32.totalorder %s47_s23, %s86_s0  ;;  %p92_p10 = scmp.lt.s32.totalorder %s86_s0, %s86_s0 }
  0x18   :  { %p93_p11 = por %p92_p10, %p91_p9 }
  0x1a   :  { %p94_p12 = pnand %p93_p11, %p87_p8 }
  0xa3   :  { %v27_v3 = vpop.xlane.xlu0 %26 }
  0xa4   :  { %v28_v4 = vrot.slane %v27_v3, 4 }
  0xa6   :  { %v29_v5 = vadd.f32 %v28_v4, %v27_v3 }
  0xa8   :  { %v30_v6 = vrot.slane %v29_v5, 2 }
  0xaa   :  { %v31_v7 = vadd.f32 %v30_v6, %v29_v5 }
  0xac   :  { %v32_v8 = vrot.slane %v31_v7, 1 }
  0xae   :  { %v33_v9 = vadd.f32 %v32_v8, %v31_v7 }
  0xb0   :  { %58 = vpush %v33_v9 }
  0xe1   :  { %s59_s20 = spop %58 }
  0xe2   :  { %s35_s21 = smul.f32 0.00048828125, %s59_s20 }
  0xe4   :  { %v36_v10 = vstv %s35_s21 }
  0xe5   :  { %v37_v11 = vsub.f32 %v23_v0, %v36_v10  ;;  %v38_v12 = vsub.f32 %v24_v1, %v36_v10 }
  0xe7   :  { %39 = vst [vmem:[#allocation5] sm:$0xff] %v37_v11  ;;  %40 = vst [vmem:[#allocation5 + $0x8] sm:$0xff] %v38_v12 }
  0xe8   :  { %97 = shalt.err (!%p94_p12)
}
  0xe9   :  { %s98_s26 = scalar_lea.hbm %s157_s1, 256 }
  0xea   :  { %p99_p13 = scmp.ne.s32.totalorder %s157_s1, %s98_s26  ;;  %p102_p0 = scmp.lt.u32.totalorder %s98_s26, %s157_s1 }
  0xec   :  { %p104_p1 = pnand %p102_p0, %p99_p13 }
  0xee   :  { %107 = shalt.err (!%p104_p1)
}
  0xef   :  { %52 = dma.vmem_to_hbm [thread:$0]  %s47_s23, 256, %s157_s1, [#allocation4], %s113_s16, %s113_s16, %s114_s17  }
  0xf0   :  { %110 = dma.done.wait [#allocation4], 256  }
  0xf1   :  { %111 = vsyncadd [#allocation4], 4294967040 }
  0xf2   :  { %56 = vsyncpa [#allocation3], 1 }
  0xf3   :  { %57 = vsyncpa [#allocation4], 1 }

</bundles_post_ra>
